<compile_context>
chip_gen: v7x
topology: tpu7x:2x2x1
jax: 0.10.0
libtpu: 0.0.40
codegen_flags: <defaults>
</compile_context>

<pallas_src>
import jax
import jax.numpy as jnp
from jax.experimental import pallas as pl
from jax.experimental.pallas import tpu as pltpu

LANE = 128


def _round_up(n, m):
    return ((n + m - 1) // m) * m


# ---------------------------------------------------------------------------
# Kernels (gate groups are GP lanes wide; padded lanes are benign zeros)
# ---------------------------------------------------------------------------
def _gru_kernel_fused(x_ref, wg_ref, bg_ref, bhn_ref, wo_ref, bo_ref, out_ref):
    """(B,Din)@(Din,3GP) -> gate elementwise -> (B,GP)@(GP,OP)."""
    f32 = jnp.float32
    GP = bhn_ref.shape[-1]
    gi = jnp.dot(x_ref[...], wg_ref[...], preferred_element_type=f32) + bg_ref[...]
    r = jax.nn.sigmoid(gi[:, 0:GP])
    one_minus_z = jax.nn.sigmoid(-gi[:, GP:2 * GP])          # 1 - sigmoid(a) == sigmoid(-a)
    n = jnp.tanh(gi[:, 2 * GP:3 * GP] + r * bhn_ref[...])
    h1 = one_minus_z * n                                      # h0 == 0
    out_ref[...] = jnp.dot(h1, wo_ref[...], preferred_element_type=f32) + bo_ref[...]


def _gru_kernel_factored(x_ref, we_ref, wg_ref, bg_ref, bhn_ref, wo_ref, bo_ref,
                         out_ref):
    """Factored form for Din > E: (B,Din)@(Din,E) -> (B,E)@(E,3GP) -> gates -> out."""
    f32 = jnp.float32
    GP = bhn_ref.shape[-1]
    e = jnp.dot(x_ref[...], we_ref[...], preferred_element_type=f32)
    gi = jnp.dot(e, wg_ref[...], preferred_element_type=f32) + bg_ref[...]
    r = jax.nn.sigmoid(gi[:, 0:GP])
    one_minus_z = jax.nn.sigmoid(-gi[:, GP:2 * GP])
    n = jnp.tanh(gi[:, 2 * GP:3 * GP] + r * bhn_ref[...])
    h1 = one_minus_z * n
    out_ref[...] = jnp.dot(h1, wo_ref[...], preferred_element_type=f32) + bo_ref[...]


# ---------------------------------------------------------------------------
# One-time parameter packing (hoisted out of the per-call path)
# ---------------------------------------------------------------------------
def prepare_params(params):
    """Pack PyTorch-layout params into lane-aligned kernel layout. Call once."""
    f32 = jnp.float32
    w_embed = params["w_embed"].astype(f32)        # (E, Din)
    b_embed = params["b_embed"].astype(f32)        # (E,)
    w_ih = params["w_ih"].astype(f32)              # (3H, E) rows [r, z, n]
    b_ih = params["b_ih"].astype(f32)              # (3H,)
    b_hh = params["b_hh"].astype(f32)              # (3H,)
    w_out = params["w_out"].astype(f32)            # (O, H)
    b_out = params["b_out"].astype(f32)            # (O,)

    E, Din = w_embed.shape
    H = w_out.shape[1]
    O = w_out.shape[0]
    GP = max(_round_up(H, LANE), LANE)             # per-gate lane pitch
    OP = max(_round_up(O, LANE), LANE)             # lane-dense output width

    w_ih_cat = w_ih.T                              # (E, 3H)
    # h0 == 0  =>  fold b_hr, b_hz into the gate biases; b_hn stays separate
    # (it is multiplied by r inside the kernel).
    b_cat = jnp.concatenate([
        b_ih[0:H] + b_hh[0:H],
        b_ih[H:2 * H] + b_hh[H:2 * H],
        b_ih[2 * H:3 * H],
    ])                                             # (3H,)
    # Embedding bias fold is exact in both fused and factored forms.
    b_gates_raw = b_embed @ w_ih_cat + b_cat       # (3H,)

    def pad_gates_cols(m3h):
        """(..., 3H) -> (..., 3*GP): each gate in its own 128-aligned group."""
        parts = []
        for g in range(3):
            blk = m3h[..., g * H:(g + 1) * H]
            pad_width = [(0, 0)] * (m3h.ndim - 1) + [(0, GP - H)]
            parts.append(jnp.pad(blk, pad_width))
        return jnp.concatenate(parts, axis=-1)

    # Only fold the embedding into the gate matmul when it does not blow up
    # FLOPs / weight footprint (feedback rule: Din <= E).
    fold_embed = Din <= E
    if fold_embed:
        w_gates = pad_gates_cols(w_embed.T @ w_ih_cat)   # (Din, 3*GP)
        w_embed_t = None
    else:
        w_gates = pad_gates_cols(w_ih_cat)               # (E, 3*GP)
        w_embed_t = w_embed.T                            # (Din, E)

    b_gates = pad_gates_cols(b_gates_raw).reshape(1, 3 * GP)
    b_hn = jnp.pad(b_hh[2 * H:3 * H], (0, GP - H)).reshape(1, GP)

    # Output linear, lane-dense: padded rows/cols are zero so padded h1 lanes
    # contribute nothing and padded output lanes are sliced away.
    w_out_p = jnp.zeros((GP, OP), f32).at[:H, :O].set(w_out.T)
    b_out_p = jnp.zeros((1, OP), f32).at[0, :O].set(b_out)

    return {
        "fold_embed": fold_embed,
        "w_embed_t": w_embed_t,
        "w_gates": w_gates,
        "b_gates": b_gates,
        "b_hn": b_hn,
        "w_out": w_out_p,
        "b_out": b_out_p,
        "dims": (Din, E, H, O, GP, OP),
    }


# ---------------------------------------------------------------------------
# Forward wrapper
# ---------------------------------------------------------------------------
def gru_forward(x, packed, *, batch_tile=2048):
    """Fused forward.  x: (B, input_dim).  `packed` from prepare_params()."""
    x = x.astype(jnp.float32)                      # PyTorch x.float()
    B, Din = x.shape
    Din_p, E, H, O, GP, OP = packed["dims"]
    assert Din == Din_p, "input_dim mismatch with packed params"

    if packed["fold_embed"]:
        kernel = _gru_kernel_fused
        weights = (packed["w_gates"], packed["b_gates"], packed["b_hn"],
                   packed["w_out"], packed["b_out"])
        flops_per_row = 2 * (Din * 3 * GP + GP * OP)
    else:
        kernel = _gru_kernel_factored
        weights = (packed["w_embed_t"], packed["w_gates"], packed["b_gates"],
                   packed["b_hn"], packed["w_out"], packed["b_out"])
        flops_per_row = 2 * (Din * E + E * 3 * GP + GP * OP)
    weight_bytes = 4 * sum(int(w.size) for w in weights)

    if B <= batch_tile:
        # Small batch: single resident block, no grid (full-array blocks).
        cost = pl.CostEstimate(
            flops=B * flops_per_row,
            transcendentals=3 * B * GP,
            bytes_accessed=4 * (x.size + B * OP) + weight_bytes,
        )
        vmem = pl.BlockSpec(memory_space=pltpu.MemorySpace.VMEM)
        out_p = pl.pallas_call(
            kernel,
            out_shape=jax.ShapeDtypeStruct((B, OP), jnp.float32),
            in_specs=[vmem] * (1 + len(weights)),
            out_specs=vmem,
            cost_estimate=cost,
        )(x, *weights)
        return out_p[:, :O]

    # Large batch: cdiv-tiled grid over the batch; pad B up to a tile multiple
    # (padded rows are zeros and are sliced away).  Weights stay resident via
    # constant index_maps; "parallel" batch axis shards tiles across TCs (v7x).
    n_tiles = pl.cdiv(B, batch_tile)
    B_pad = n_tiles * batch_tile
    if B_pad != B:
        x = jnp.pad(x, ((0, B_pad - B), (0, 0)))

    cost = pl.CostEstimate(
        flops=B_pad * flops_per_row,
        transcendentals=3 * B_pad * GP,
        bytes_accessed=4 * (B_pad * Din + B_pad * OP) + weight_bytes,
    )
    const2d = lambda i: (0, 0)
    w_specs = [pl.BlockSpec(w.shape, const2d) for w in weights]
    out_p = pl.pallas_call(
        kernel,
        out_shape=jax.ShapeDtypeStruct((B_pad, OP), jnp.float32),
        grid=(n_tiles,),
        in_specs=[pl.BlockSpec((batch_tile, Din), lambda i: (i, 0))] + w_specs,
        out_specs=pl.BlockSpec((batch_tile, OP), lambda i: (i, 0)),
        compiler_params=pltpu.CompilerParams(
            dimension_semantics=("parallel",)),
        cost_estimate=cost,
    )(x, *weights)
    return out_p[:B, :O]


# ---------------------------------------------------------------------------
# Init + pure-JAX reference (faithful, un-folded PyTorch semantics)
# ---------------------------------------------------------------------------
def init_params(key, input_dim, embed_dim, hidden_dim, output_size):
    ks = jax.random.split(key, 8)

    def u(k, shape, fan_in):
        bound = 1.0 / jnp.sqrt(jnp.float32(fan_in))
        return jax.random.uniform(k, shape, jnp.float32, -bound, bound)

    return {
        "w_embed": u(ks[0], (embed_dim, input_dim), input_dim),
        "b_embed": u(ks[1], (embed_dim,), input_dim),
        "w_ih":    u(ks[2], (3 * hidden_dim, embed_dim), hidden_dim),
        "w_hh":    u(ks[3], (3 * hidden_dim, hidden_dim), hidden_dim),
        "b_ih":    u(ks[4], (3 * hidden_dim,), hidden_dim),
        "b_hh":    u(ks[5], (3 * hidden_dim,), hidden_dim),
        "w_out":   u(ks[6], (output_size, hidden_dim), hidden_dim),
        "b_out":   u(ks[7], (output_size,), hidden_dim),
    }


def reference_forward(x, params):
    H = params["w_out"].shape[1]
    e = x.astype(jnp.float32) @ params["w_embed"].T + params["b_embed"]
    h0 = jnp.zeros((x.shape[0], H), jnp.float32)
    gi = e @ params["w_ih"].T + params["b_ih"]
    gh = h0 @ params["w_hh"].T + params["b_hh"]
    r = jax.nn.sigmoid(gi[:, 0:H] + gh[:, 0:H])
    z = jax.nn.sigmoid(gi[:, H:2 * H] + gh[:, H:2 * H])
    n = jnp.tanh(gi[:, 2 * H:] + r * gh[:, 2 * H:])
    h1 = (1.0 - z) * n + z * h0
    return h1 @ params["w_out"].T + params["b_out"]


if __name__ == "__main__":
    key = jax.random.PRNGKey(0)
    k_x1, k_x2, k_x3, k_p1, k_p2 = jax.random.split(key, 5)

    # Config 1: Din <= E  ->  embed folded into gate matmul (fused kernel).
    input_dim, embed_dim, hidden_dim, output_size = 16, 32, 32, 8
    params = init_params(k_p1, input_dim, embed_dim, hidden_dim, output_size)
    packed = prepare_params(params)                 # one-time packing

    # Small batch: gridless single-block path.
    x = jax.random.normal(k_x1, (4, input_dim), jnp.float32)
    out = jax.block_until_ready(gru_forward(x, packed))
    ref = reference_forward(x, params)
    assert out.shape == (4, output_size)
    assert jnp.allclose(out, ref, atol=1e-4, rtol=1e-4)

    # Larger, non-divisible batch: cdiv-tiled grid path with batch padding.
    x2 = jax.random.normal(k_x2, (600, input_dim), jnp.float32)
    out2 = jax.block_until_ready(gru_forward(x2, packed, batch_tile=256))
    ref2 = reference_forward(x2, params)
    assert out2.shape == (600, output_size)
    assert jnp.allclose(out2, ref2, atol=1e-4, rtol=1e-4)

    # Config 2: Din > E  ->  factored two-matmul kernel (no embed fold).
    params_f = init_params(k_p2, 64, 32, 32, 8)
    packed_f = prepare_params(params_f)
    x3 = jax.random.normal(k_x3, (8, 64), jnp.float32)
    out3 = jax.block_until_ready(gru_forward(x3, packed_f))
    ref3 = reference_forward(x3, params_f)
    assert out3.shape == (8, 8)
    assert jnp.allclose(out3, ref3, atol=1e-4, rtol=1e-4)

    print("KERNEL_OK")
</pallas_src>

<mosaic_0001>
module attributes {stable_mosaic.version = 11 : i64} {
  func.func @_gru_kernel_fused(%arg0: memref<4x16xf32, #tpu.memory_space<vmem>>, %arg1: memref<16x384xf32, #tpu.memory_space<vmem>>, %arg2: memref<1x384xf32, #tpu.memory_space<vmem>>, %arg3: memref<1x128xf32, #tpu.memory_space<vmem>>, %arg4: memref<128x128xf32, #tpu.memory_space<vmem>>, %arg5: memref<1x128xf32, #tpu.memory_space<vmem>>, %arg6: memref<4x128xf32, #tpu.memory_space<vmem>>) attributes {dimension_semantics = [], scalar_prefetch = 0 : i64, scratch_operands = 0 : i64, tpu.core_type = #tpu.core_type<tc>} {
    %c0 = arith.constant 0 : index
    %c0_0 = arith.constant 0 : index
    %0 = vector.load %arg0[%c0, %c0_0] : memref<4x16xf32, #tpu.memory_space<vmem>>, vector<4x16xf32>
    %c0_1 = arith.constant 0 : index
    %c0_2 = arith.constant 0 : index
    %1 = vector.load %arg1[%c0_1, %c0_2] : memref<16x384xf32, #tpu.memory_space<vmem>>, vector<16x384xf32>
    %cst = arith.constant dense<0.000000e+00> : vector<4x384xf32>
    %2 = tpu.matmul %0, %1, %cst {dimension_numbers = #tpu.dot_dimension_numbers<[1], [0], [0], [1], [0, 0, 1, 1], [], []>} : vector<4x16xf32>, vector<16x384xf32>, vector<4x384xf32> -> vector<4x384xf32>
    %c0_3 = arith.constant 0 : index
    %c0_4 = arith.constant 0 : index
    %3 = vector.load %arg2[%c0_3, %c0_4] : memref<1x384xf32, #tpu.memory_space<vmem>>, vector<1x384xf32>
    %4 = vector.broadcast %3 : vector<1x384xf32> to vector<4x384xf32>
    %5 = arith.addf %2, %4 : vector<4x384xf32>
    %6 = vector.extract_strided_slice %5 {offsets = [0, 0], sizes = [4, 128], strides = [1, 1]} : vector<4x384xf32> to vector<4x128xf32>
    %7 = arith.negf %6 : vector<4x128xf32>
    %8 = math.exp %7 : vector<4x128xf32>
    %cst_5 = arith.constant 1.000000e+00 : f32
    %9 = vector.broadcast %cst_5 : f32 to vector<4x128xf32>
    %10 = arith.addf %9, %8 : vector<4x128xf32>
    %11 = arith.divf %9, %10 : vector<4x128xf32>
    %12 = vector.extract_strided_slice %5 {offsets = [0, 128], sizes = [4, 128], strides = [1, 1]} : vector<4x384xf32> to vector<4x128xf32>
    %cst_6 = arith.constant 0.000000e+00 : f32
    %13 = vector.broadcast %cst_6 : f32 to vector<4x128xf32>
    %14 = arith.subf %13, %12 : vector<4x128xf32>
    %15 = arith.negf %14 : vector<4x128xf32>
    %16 = math.exp %15 : vector<4x128xf32>
    %cst_7 = arith.constant 1.000000e+00 : f32
    %17 = vector.broadcast %cst_7 : f32 to vector<4x128xf32>
    %18 = arith.addf %17, %16 : vector<4x128xf32>
    %19 = arith.divf %17, %18 : vector<4x128xf32>
    %20 = vector.extract_strided_slice %5 {offsets = [0, 256], sizes = [4, 128], strides = [1, 1]} : vector<4x384xf32> to vector<4x128xf32>
    %c0_8 = arith.constant 0 : index
    %c0_9 = arith.constant 0 : index
    %21 = vector.load %arg3[%c0_8, %c0_9] : memref<1x128xf32, #tpu.memory_space<vmem>>, vector<1x128xf32>
    %22 = vector.broadcast %21 : vector<1x128xf32> to vector<4x128xf32>
    %23 = arith.mulf %11, %22 : vector<4x128xf32>
    %24 = arith.addf %20, %23 : vector<4x128xf32>
    %25 = math.tanh %24 : vector<4x128xf32>
    %26 = arith.mulf %19, %25 : vector<4x128xf32>
    %c0_10 = arith.constant 0 : index
    %c0_11 = arith.constant 0 : index
    %27 = vector.load %arg4[%c0_10, %c0_11] : memref<128x128xf32, #tpu.memory_space<vmem>>, vector<128x128xf32>
    %cst_12 = arith.constant dense<0.000000e+00> : vector<4x128xf32>
    %28 = tpu.matmul %26, %27, %cst_12 {dimension_numbers = #tpu.dot_dimension_numbers<[1], [0], [0], [1], [0, 0, 1, 1], [], []>} : vector<4x128xf32>, vector<128x128xf32>, vector<4x128xf32> -> vector<4x128xf32>
    %c0_13 = arith.constant 0 : index
    %c0_14 = arith.constant 0 : index
    %29 = vector.load %arg5[%c0_13, %c0_14] : memref<1x128xf32, #tpu.memory_space<vmem>>, vector<1x128xf32>
    %30 = vector.broadcast %29 : vector<1x128xf32> to vector<4x128xf32>
    %31 = arith.addf %28, %30 : vector<4x128xf32>
    %c0_15 = arith.constant 0 : index
    %c0_16 = arith.constant 0 : index
    %32 = vector.load %arg6[%c0_15, %c0_16] : memref<4x128xf32, #tpu.memory_space<vmem>>, vector<4x128xf32>
    tpu.vector_store %arg6[%c0_15, %c0_16], %31 {strides = array<i32>} : memref<4x128xf32, #tpu.memory_space<vmem>>, vector<4x128xf32>,
    return
  }
}

</mosaic_0001>

<bundles_post_ra>
// kernel: tpu_custom_call.1
= control target key start
LH: loop header
LB: loop body
LE: loop exit
PB: predicated region body
PF: predicated region fallthrough
CT: control target
= control target key end

     0   :  { %11 = vsyncpa [#allocation3], 0  ;;  %s685_s0 = inlined_call_operand.hbm [shape: f32[4,16], index: 0, kind: input, shape index: {}]   ;;  %s686_s1 = inlined_call_operand.hbm [shape: f32[16,384], index: 1, kind: input, shape index: {}]   ;;  %s687_s2 = inlined_call_operand.vmem [shape: f32[1,384], index: 2, kind: input, shape index: {}]   ;;  %s688_s3 = inlined_call_operand.vmem [shape: f32[1,128], index: 3, kind: input, shape index: {}]   ;;  %s689_s4 = inlined_call_operand.hbm [shape: f32[128,128], index: 4, kind: input, shape index: {}]   ;;  %s690_s5 = inlined_call_operand.vmem [shape: f32[1,128], index: 5, kind: input, shape index: {}]   ;;  %s691_s6 = inlined_call_operand.hbm [shape: f32[4,128], index: 6, kind: output, shape index: {}]  }
   0x1   :  { %12 = vsyncpa [#allocation6], 0 }
   0x2   :  { %13 = vsyncpa [#allocation4], 0  ;;  %s580_s21 = smov [#allocation5]   ;;  %s486_s25 = scalar_lea.hbm %s686_s1, 768 }
   0x3   :  { %s29_s22 = sshll.u32 %s580_s21, 4  ;;  %p487_p0 = scmp.ne.s32.totalorder %s686_s1, %s486_s25  ;;  %s30_s22 = int_to_ptr.vmem [resolvable:$true] %s29_s22 }
   0x4   :  { %p490_p1 = scmp.lt.u32.totalorder %s486_s25, %s686_s1 }
   0x6   :  { %p492_p2 = pnand %p490_p1, %p487_p0 }
   0x8   :  { %495 = shalt.err (!%p492_p2)
}
   0x9   :  { %s496_s30 = scalar_lea.vmem %s30_s22, 768  ;;  %p501_p4 = scmp.lt.s32.totalorder %s30_s22, %s30_s22 }
   0xa   :  { %p497_p3 = scmp.ne.s32.totalorder %s30_s22, %s496_s30  ;;  %p502_p5 = scmp.lt.s32.totalorder %s496_s30, %s496_s30 }
   0xc   :  { %p503_p6 = por %p502_p5, %p501_p4 }
   0xe   :  { %p504_p7 = pnand %p503_p6, %p497_p3 }
  0x10   :  { %507 = shalt.err (!%p504_p7)
}
  0x11   :  { %s581_s7 = smov 384   ;;  %s582_s8 = smov 24  }
  0x12   :  { %35 = dma.hbm_to_vmem [thread:$0]  %s686_s1, 768, %s30_s22, [#allocation6], %s581_s7, %s581_s7, %s582_s8  }
  0x13   :  { %s583_s11 = smov [#allocation2]   ;;  %s584_s13 = smov [#allocation7]  }
  0x14   :  { %s20_s12 = sshll.u32 %s583_s11, 4  ;;  %s45_s14 = sshll.u32 %s584_s13, 4  ;;  %s21_s12 = int_to_ptr.vmem [resolvable:$true] %s20_s12  ;;  %s46_s14 = int_to_ptr.vmem [resolvable:$true] %s45_s14 }
  0x15   :  { %s508_s17 = scalar_lea.hbm %s685_s0, 64 }
  0x16   :  { %p509_p8 = scmp.ne.s32.totalorder %s685_s0, %s508_s17  ;;  %p512_p9 = scmp.lt.u32.totalorder %s508_s17, %s685_s0 }
  0x18   :  { %p514_p10 = pnand %p512_p9, %p509_p8 }
  0x1a   :  { %517 = shalt.err (!%p514_p10)
}
  0x1b   :  { %s518_s1 = scalar_lea.vmem %s21_s12, 64  ;;  %p523_p12 = scmp.lt.s32.totalorder %s21_s12, %s21_s12 }
  0x1c   :  { %p519_p11 = scmp.ne.s32.totalorder %s21_s12, %s518_s1  ;;  %p524_p13 = scmp.lt.s32.totalorder %s518_s1, %s518_s1 }
  0x1e   :  { %p525_p0 = por %p524_p13, %p523_p12 }
  0x20   :  { %p526_p1 = pnand %p525_p0, %p519_p11 }
  0x22   :  { %529 = shalt.err (!%p526_p1)
}
  0x23   :  { %23 = dma.hbm_to_vmem [thread:$0]  %s685_s0, 64, %s21_s12, [#allocation3]  }
  0x24   :  { %s530_s26 = scalar_lea.hbm %s689_s4, 2048 }
  0x25   :  { %p531_p2 = scmp.ne.s32.totalorder %s689_s4, %s530_s26  ;;  %p534_p3 = scmp.lt.u32.totalorder %s530_s26, %s689_s4 }
  0x27   :  { %p536_p4 = pnand %p534_p3, %p531_p2 }
  0x29   :  { %539 = shalt.err (!%p536_p4)
}
  0x2a   :  { %s540_s7 = scalar_lea.vmem %s46_s14, 2048  ;;  %p545_p6 = scmp.lt.s32.totalorder %s46_s14, %s46_s14 }
  0x2b   :  { %p541_p5 = scmp.ne.s32.totalorder %s46_s14, %s540_s7  ;;  %p546_p7 = scmp.lt.s32.totalorder %s540_s7, %s540_s7 }
  0x2d   :  { %p547_p8 = por %p546_p7, %p545_p6 }
  0x2f   :  { %p548_p9 = pnand %p547_p8, %p541_p5 }
  0x31   :  { %551 = shalt.err (!%p548_p9)
}
  0x32   :  { %s585_s0 = smov 128   ;;  %s586_s8 = smov 8  }
  0x33   :  { %51 = dma.hbm_to_vmem [thread:$0]  %s689_s4, 2048, %s46_s14, [#allocation6], %s585_s0, %s585_s0, %s586_s8  }
  0x34   :  { %574 = dma.done.wait [#allocation3], 64  }
  0x35   :  { %575 = vsyncadd [#allocation3], 4294967232 }
  0x36   :  { %576 = dma.done.wait [#allocation6], 2816  }
  0x37   :  { %577 = vsyncadd [#allocation6], 4294964480  ;;  %v587_v0 = vmov 0.0   ;;  %v588_v1 = vmov 0.0|0.0   ;;  %vm589_vm0 = vmmov 0   ;;  %v65_v2 = vld [vmem:[#allocation5 + $0x8] sm:$0xff]  ;;  %v72_v36 = vlaneseq }
  0x38   :  { %155 = vmatprep.mubr.f32.mxu1 %v587_v0  ;;  %441 = vmatprep.subr.bf16.mxu0 %v588_v1  ;;  %v68_v3 = vld [vmem:[#allocation5 + $0x20] sm:$0xff]  ;;  %v67_v6 = vld [vmem:[#allocation5 + $0x18] sm:$0xff]  ;;  %v66_v7 = vld [vmem:[#allocation5 + $0x10] sm:$0xff]  ;;  %vm87_vm1 = vcmask 130048   ;;  %s590_s15 = smov [#allocation8]  }
  0x39   :  { %431 = vmatprep.mubr.msk.f32.mxu0 %vm589_vm0, %v587_v0  ;;  %v64_v4 = vld [vmem:[#allocation5] sm:$0xff]  ;;  %v434_v5 = vpack.c.bf16 %v68_v3, %v65_v2  ;;  %v69_v9 = vld [vmem:[#allocation5 + $0x28] sm:$0xff]  ;;  %v63_v10 = vld [vmem:[#allocation2] sm:$0xf]  ;;  %v73_v37 = vshrl.u32 %v72_v36, 7  ;;  %s356_s16 = sshll.u32 %s590_s15, 4  ;;  %s357_s16 = int_to_ptr.vmem [resolvable:$true] %s356_s16 }
  0x3a   :  { %v436_v8 = vpack.c.bf16 %v67_v6, %v64_v4  ;;  %v439_v11 = vpack.c.bf16 %v69_v9, %v66_v7  ;;  %v256_v12 = vld [vmem:[#allocation7] sm:$0xff]  ;;  %v257_v13 = vld [vmem:[#allocation7 + $0x8] sm:$0xff]  ;;  %v258_v15 = vld [vmem:[#allocation7 + $0x10] sm:$0xff]  ;;  %p557_p11 = scmp.lt.s32.totalorder %s357_s16, %s357_s16 }
  0x3b   :  { %435 = vmatprep.subr.bf16.mxu1 %v434_v5  ;;  %v442_v14 = vpack.c.bf16 %v257_v13, %v256_v12  ;;  %v259_v16 = vld [vmem:[#allocation7 + $0x18] sm:$0xff]  ;;  %v260_v18 = vld [vmem:[#allocation7 + $0x20] sm:$0xff]  ;;  %v261_v19 = vld [vmem:[#allocation7 + $0x28] sm:$0xff]  ;;  %v74_v38 = vsub.s32 0, %v73_v37  ;;  %v78_v40 = vsub.s32 1, %v73_v37  ;;  %v82_v54 = vsub.s32 2, %v73_v37 }
  0x3c   :  { %437 = vmatpush1.bf16.msra.mxu1 %v436_v8  ;;  %v445_v17 = vpack.c.bf16 %v259_v16, %v258_v15  ;;  %v448_v20 = vpack.c.bf16 %v261_v19, %v260_v18  ;;  %v262_v21 = vld [vmem:[#allocation7 + $0x30] sm:$0xff]  ;;  %v263_v22 = vld [vmem:[#allocation7 + $0x38] sm:$0xff]  ;;  %v264_v24 = vld [vmem:[#allocation7 + $0x40] sm:$0xff] }
  0x3d   :  { %438 = vmatprep.subr.bf16.mxu1 %v588_v1  ;;  %443 = vmatpush3.bf16.msra.mxu0 %v442_v14  ;;  %v451_v23 = vpack.c.bf16 %v263_v22, %v262_v21  ;;  %v265_v25 = vld [vmem:[#allocation7 + $0x48] sm:$0xff]  ;;  %v266_v27 = vld [vmem:[#allocation7 + $0x50] sm:$0xff]  ;;  %v267_v28 = vld [vmem:[#allocation7 + $0x58] sm:$0xff] }
  0x3e   :  { %444 = vmatprep.subr.bf16.mxu0 %v588_v1  ;;  %v454_v26 = vpack.c.bf16 %v265_v25, %v264_v24  ;;  %v457_v29 = vpack.c.bf16 %v267_v28, %v266_v27  ;;  %v268_v30 = vld [vmem:[#allocation7 + $0x60] sm:$0xff]  ;;  %v269_v31 = vld [vmem:[#allocation7 + $0x68] sm:$0xff]  ;;  %v270_v33 = vld [vmem:[#allocation7 + $0x70] sm:$0xff] }
  0x3f   :  { %366 = vmatmul.mubr.msk.f32.vlgmr.msra.gmra.mrb[0].mxu1 %vm87_vm1, %v63_v10  ;;  %v460_v32 = vpack.c.bf16 %v269_v31, %v268_v30  ;;  %v271_v34 = vld [vmem:[#allocation7 + $0x78] sm:$0xff]  ;;  %v70_v39 = vld [vmem:[%s687_s2] sm:$0x7] }
  0x40   :  { %440 = vmatpush3.bf16.msra.mxu1 %v439_v11  ;;  %396 = vmatprep.mubr.msk.f32.mxu1 %vm589_vm0, %v587_v0  ;;  %v463_v35 = vpack.c.bf16 %v271_v34, %v270_v33  ;;  %v75_v41 = vrot.slane %v70_v39, %v74_v38  ;;  %v79_v42 = vrot.slane %v70_v39, %v78_v40  ;;  %v370_v57 = vld [vmem:[%s688_s3] ss:$0 sm:$0xff]  ;;  %s552_s3 = scalar_lea.vmem %s357_s16, 64 }
  0x41   :  { %446 = vmatpush3.bf16.msra.mxu0 %v445_v17  ;;  %v83_v55 = vrot.slane %v70_v39, %v82_v54  ;;  %v371_v2 = vld [vmem:[%s690_s5] ss:$0 sm:$0xff]  ;;  %p553_p10 = scmp.ne.s32.totalorder %s357_s16, %s552_s3  ;;  %p558_p12 = scmp.lt.s32.totalorder %s552_s3, %s552_s3 }
  0x42   :  { %447 = vmatprep.subr.bf16.mxu0 %v588_v1 }
  0x43   :  { %397 = vmatmul.mubr.msk.f32.vlgmr.msra.gmra.mrb[2].mxu1 %vm87_vm1, %v63_v10  ;;  %p559_p13 = por %p558_p12, %p557_p11 }
  0x45   :  { %449 = vmatpush3.bf16.msra.mxu0 %v448_v20  ;;  %p560_p0 = pnand %p559_p13, %p553_p10 }
  0x46   :  { %450 = vmatprep.subr.bf16.mxu0 %v588_v1 }
  0x49   :  { %452 = vmatpush3.bf16.msra.mxu0 %v451_v23 }
  0x4a   :  { %453 = vmatprep.subr.bf16.mxu0 %v588_v1 }
  0x4d   :  { %455 = vmatpush3.bf16.msra.mxu0 %v454_v26 }
  0x4e   :  { %456 = vmatprep.subr.bf16.mxu0 %v588_v1 }
  0x51   :  { %458 = vmatpush3.bf16.msra.mxu0 %v457_v29 }
  0x52   :  { %459 = vmatprep.subr.bf16.mxu0 %v588_v1 }
  0x55   :  { %461 = vmatpush3.bf16.msra.mxu0 %v460_v32 }
  0x56   :  { %462 = vmatprep.subr.bf16.mxu0 %v588_v1 }
  0x59   :  { %464 = vmatpush3.bf16.msra.mxu0 %v463_v35 }
 0x112   :  { %v157_v43 = vpop.f32.mrb[0].mxu1 }
 0x113   :  { %v158_v44 = vadd.f32 %v157_v43, %v75_v41  ;;  %v159_v45 = vpop.f32.mrb[1].mxu1 }
 0x114   :  { %v160_v47 = vadd.f32 %v159_v45, %v79_v42 }
 0x115   :  { %v368_v46 = vmul.f32 -1.442695, %v158_v44 }
 0x116   :  { %v228_v48 = vpop.f32.mrb[2].mxu1  ;;  %v238_v50 = vsub.f32 0.0, %v160_v47 }
 0x117   :  { %476 = vpow2.f32 %v368_v46  ;;  %v398_v49 = vpop.f32.mrb[3].mxu1  ;;  %v229_v58 = vadd.f32 %v228_v48, %v83_v55 }
 0x118   :  { %v369_v51 = vmul.f32 -1.442695, %v238_v50 }
 0x11a   :  { %478 = vpow2.f32 %v369_v51 }
 0x121   :  { %v477_v52 = vpop.eup %476 }
 0x122   :  { %v235_v53 = vadd.f32 1.0, %v477_v52 }
 0x124   :  { %480 = vrcp.f32 %v235_v53  ;;  %v479_v56 = vpop.eup %478 }
 0x125   :  { %v242_v60 = vadd.f32 1.0, %v479_v56 }
 0x127   :  { %482 = vrcp.f32 %v242_v60 }
 0x12e   :  { %v481_v59 = vpop.eup %480 }
 0x12f   :  { %v252_v61 = vmul.f32 %v481_v59, %v370_v57 }
 0x131   :  { %v253_v62 = vadd.f32 %v252_v61, %v229_v58  ;;  %v483_v63 = vpop.eup %482 }
 0x133   :  { %484 = vtanh.f32 %v253_v62 }
 0x13d   :  { %v485_v0 = vpop.eup %484 }
 0x13e   :  { %v255_v1 = vmul.f32 %v485_v0, %v483_v63 }
 0x140   :  { %432 = vmatmul.mubr.f32.vlgmr.msra.gmra.mrb[0].mxu0 %v255_v1 }
 0x213   :  { %v345_v3 = vpop.f32.mrb[0].mxu0 }
 0x214   :  { %v346_v4 = vadd.f32 %v371_v2, %v345_v3  ;;  %v433_v5 = vpop.f32.mrb[1].mxu0 }
 0x216   :  { %349 = vst [vmem:[#allocation8] sm:$0xf] %v346_v4 }
 0x217   :  { %563 = shalt.err (!%p560_p0)
}
 0x218   :  { %s564_s19 = scalar_lea.hbm %s691_s6, 64 }
 0x219   :  { %p565_p1 = scmp.ne.s32.totalorder %s691_s6, %s564_s19  ;;  %p568_p2 = scmp.lt.u32.totalorder %s564_s19, %s691_s6 }
 0x21b   :  { %p570_p3 = pnand %p568_p2, %p565_p1 }
 0x21d   :  { %573 = shalt.err (!%p570_p3)
}
 0x21e   :  { %359 = dma.vmem_to_hbm [thread:$0]  %s357_s16, 64, %s691_s6, [#allocation4]  }
 0x21f   :  { %578 = dma.done.wait [#allocation4], 64  }
 0x220   :  { %579 = vsyncadd [#allocation4], 4294967232 }
 0x221   :  { %363 = vsyncpa [#allocation3], 1 }
 0x222   :  { %364 = vsyncpa [#allocation6], 1 }
 0x223   :  { %365 = vsyncpa [#allocation4], 1 }

</bundles_post_ra>
